<compile_context>
chip_gen: v6e
topology: v6e:2x2x1
jax: 0.10.0
libtpu: 0.0.40
codegen_flags: <defaults>
</compile_context>

<pallas_src>
import math
import jax
import jax.numpy as jnp
from jax.experimental import pallas as pl
from jax.experimental.pallas import tpu as pltpu


# ---------------------------------------------------------------------------
# Pallas kernels. Scalar-prefetched (SMEM): scale (C,), bias (C,), new_h (N,),
# new_w (N,). Blocks: img (1, C, Hp, Wp) bf16, wh (1, tile_h, Hp) bf16,
# wwT (1, Wp, pad_w) bf16, out (1, C, tile_h, pad_w).
# ---------------------------------------------------------------------------
def _valid_mask(newh_ref, neww_ref, n, t, tile_h, pad_w):
    row = jax.lax.broadcasted_iota(jnp.int32, (tile_h, pad_w), 0) + t * tile_h
    col = jax.lax.broadcasted_iota(jnp.int32, (tile_h, pad_w), 1)
    return jnp.logical_and(row < newh_ref[n], col < neww_ref[n]).astype(jnp.float32)


def _norm_resize_wh_first_kernel(scale_ref, bias_ref, newh_ref, neww_ref,
                                 img_ref, wh_ref, wwT_ref, out_ref):
    n = pl.program_id(0)
    t = pl.program_id(1)
    C, tile_h, pad_w = out_ref.shape[1], out_ref.shape[2], out_ref.shape[3]
    wh = wh_ref[0]                                   # (tile_h, Hp) bf16
    wwT = wwT_ref[0]                                 # (Wp, pad_w) bf16
    mask = _valid_mask(newh_ref, neww_ref, n, t, tile_h, pad_w)
    for c in range(C):                               # C is small & static
        tmp = jnp.dot(wh, img_ref[0, c], preferred_element_type=jnp.float32)
        mm = jnp.dot(tmp.astype(jnp.bfloat16), wwT, preferred_element_type=jnp.float32)
        out_ref[0, c] = ((mm * scale_ref[c] + bias_ref[c]) * mask).astype(out_ref.dtype)


def _norm_resize_ww_first_kernel(scale_ref, bias_ref, newh_ref, neww_ref,
                                 img_ref, wh_ref, wwT_ref, out_ref, tmp_ref):
    n = pl.program_id(0)
    t = pl.program_id(1)
    C, tile_h, pad_w = out_ref.shape[1], out_ref.shape[2], out_ref.shape[3]

    # Cache tmp = img @ WwT once per image (row-tile axis is sequential/"arbitrary").
    @pl.when(t == 0)
    def _():
        for c in range(C):
            tmp_ref[c] = jnp.dot(img_ref[0, c], wwT_ref[0],
                                 preferred_element_type=jnp.float32).astype(jnp.bfloat16)

    wh = wh_ref[0]                                   # (tile_h, Hp) bf16
    mask = _valid_mask(newh_ref, neww_ref, n, t, tile_h, pad_w)
    for c in range(C):
        mm = jnp.dot(wh, tmp_ref[c], preferred_element_type=jnp.float32)
        out_ref[0, c] = ((mm * scale_ref[c] + bias_ref[c]) * mask).astype(out_ref.dtype)


# ---------------------------------------------------------------------------
# Host-side planning helpers
# ---------------------------------------------------------------------------
def _round_up(x, m):
    return int(-(-int(x) // int(m)) * int(m))


def _choose_order(Hp, Wp, pad_h, pad_w):
    """MXU FLOP model per (image, channel); ww-first caches its first matmul."""
    cost_wh = pad_h * Hp * Wp + pad_h * Wp * pad_w
    cost_ww = Hp * Wp * pad_w + pad_h * Hp * pad_w
    return "wh_first" if cost_wh <= cost_ww else "ww_first"


def _vmem_footprint(tile_h, order, C, Hp, Wp, pad_w, out_itemsize):
    bf = 2
    img = 2 * C * Hp * Wp * bf                       # double-buffered bf16 image block
    wh = 2 * tile_h * Hp * bf
    wwt = 2 * Wp * pad_w * bf
    out = 2 * C * tile_h * pad_w * out_itemsize
    scr = C * Hp * pad_w * bf if order == "ww_first" else 0
    tmp = 2 * tile_h * max(Wp, pad_w) * 4            # in-flight f32 matmul results
    return img + wh + wwt + out + scr + tmp


def _pick_tile_h(pad_h, fits):
    """Row-tile size: keep >=256 for large pad_h (MXU fill / fewer steps), minimize
    padded overhang, stay inside the VMEM budget."""
    if pad_h <= 512:
        t = pad_h
        while t > 32 and not fits(t):
            t -= 32
        return max(t, 32)
    big = [t for t in range(512, 255, -32) if fits(t)]
    if big:
        return min(big, key=lambda t: (-(-pad_h // t) * t, -t))
    small = [t for t in range(224, 31, -32) if fits(t)]
    return small[0] if small else 32


def _plan(C, Hp, Wp, pad_h, pad_w, out_itemsize, order=None):
    if order is None:
        order = _choose_order(Hp, Wp, pad_h, pad_w)
    budget = 44 * 1024 * 1024

    def fits(t):
        return _vmem_footprint(t, order, C, Hp, Wp, pad_w, out_itemsize) <= budget

    tile_h = _pick_tile_h(pad_h, fits)
    n_hp = -(-pad_h // tile_h)
    rows = n_hp * tile_h
    foot = _vmem_footprint(tile_h, order, C, Hp, Wp, pad_w, out_itemsize)
    # v7x has 64 MiB physical VMEM: derive the limit from the footprint, cap at 56 MB
    # unless the footprint itself cannot be reduced further.
    vmem_limit = int(min(max(int(foot * 1.25) + (4 << 20), 24 << 20), 56 << 20))
    if foot + (2 << 20) > vmem_limit:
        vmem_limit = int(foot) + (8 << 20)
    return order, tile_h, n_hp, rows, vmem_limit


def _interp_matrix(in_size, out_size, pad_size):
    """Bilinear (align_corners=False, recompute_scale_factor=True) interpolation
    matrix of shape (pad_size, in_size). Rows >= out_size are zero, so the result
    is automatically zero-padded, reproducing batch_images' padding."""
    dst = jnp.arange(pad_size, dtype=jnp.float32)
    src = (dst + 0.5) * (float(in_size) / float(out_size)) - 0.5
    src = jnp.maximum(src, 0.0)                      # PyTorch clamps lower bound only
    i0 = jnp.floor(src).astype(jnp.int32)
    i0 = jnp.clip(i0, 0, in_size - 1)
    i1 = jnp.minimum(i0 + 1, in_size - 1)
    w1 = src - i0.astype(jnp.float32)
    w0 = 1.0 - w1
    oh0 = jax.nn.one_hot(i0, in_size, dtype=jnp.float32)
    oh1 = jax.nn.one_hot(i1, in_size, dtype=jnp.float32)
    mat = w0[:, None] * oh0 + w1[:, None] * oh1
    valid = (dst < float(out_size)).astype(jnp.float32)
    return mat * valid[:, None]


def _resized_hw(h, w, self_min_size, self_max_size):
    min_sz = float(min(h, w))
    max_sz = float(max(h, w))
    scale_factor = self_min_size / min_sz
    if max_sz * scale_factor > self_max_size:
        scale_factor = self_max_size / max_sz
    # recompute_scale_factor=True: output size = floor(in * scale)
    return int(math.floor(h * scale_factor)), int(math.floor(w * scale_factor))


# ---------------------------------------------------------------------------
# Fused normalize + resize + pad/batch
# ---------------------------------------------------------------------------
def _normalize_resize_batch(imgs, orig_sizes, new_sizes, pad_h, pad_w, scale, bias,
                            out_dtype=jnp.float32, order=None):
    """imgs: (N, C, Hp, Wp) bf16 zero-padded slab. Returns (N, C, pad_h, pad_w)."""
    N, C, Hp, Wp = imgs.shape
    order, tile_h, n_hp, rows, vmem_limit = _plan(
        C, Hp, Wp, pad_h, pad_w, jnp.dtype(out_dtype).itemsize, order)

    # Per-image interpolation matrices (bf16 for the MXU). Zero rows/cols past the
    # resized size realize batch_images' zero padding; zero contraction cols/rows
    # make the common Hp/Wp contraction exact. wh has `rows` (= n_hp*tile_h) rows so
    # every row-tile read is in-bounds; output overhang rows are dropped on store.
    wh_all = jnp.stack([
        jnp.pad(_interp_matrix(h, nh, rows), ((0, 0), (0, Hp - h)))
        for (h, _), (nh, _) in zip(orig_sizes, new_sizes)]).astype(jnp.bfloat16)
    wwT_all = jnp.stack([
        jnp.pad(_interp_matrix(w, nw, pad_w).T, ((0, Wp - w), (0, 0)))
        for (_, w), (_, nw) in zip(orig_sizes, new_sizes)]).astype(jnp.bfloat16)
    new_h = jnp.asarray([nh for nh, _ in new_sizes], jnp.int32)
    new_w = jnp.asarray([nw for _, nw in new_sizes], jnp.int32)

    if order == "wh_first":
        kernel = _norm_resize_wh_first_kernel
        scratch = []
        semantics = ("parallel", "parallel")
    else:
        kernel = _norm_resize_ww_first_kernel
        scratch = [pltpu.VMEM((C, Hp, pad_w), jnp.bfloat16)]   # cached img @ WwT
        semantics = ("parallel", "arbitrary")                  # t sequential for the cache

    grid_spec = pltpu.PrefetchScalarGridSpec(
        num_scalar_prefetch=4,                                  # scale, bias, new_h, new_w
        grid=(N, n_hp),
        in_specs=[
            pl.BlockSpec((1, C, Hp, Wp), lambda n, t, *_: (n, 0, 0, 0)),
            pl.BlockSpec((1, tile_h, Hp), lambda n, t, *_: (n, t, 0)),
            pl.BlockSpec((1, Wp, pad_w), lambda n, t, *_: (n, 0, 0)),
        ],
        out_specs=pl.BlockSpec((1, C, tile_h, pad_w), lambda n, t, *_: (n, 0, t, 0)),
        scratch_shapes=scratch,
    )
    return pl.pallas_call(
        kernel,
        out_shape=jax.ShapeDtypeStruct((N, C, pad_h, pad_w), out_dtype),
        grid_spec=grid_spec,
        compiler_params=pltpu.CompilerParams(
            dimension_semantics=semantics,
            vmem_limit_bytes=vmem_limit,
        ),
    )(scale, bias, new_h, new_w, imgs, wh_all, wwT_all)


# ---------------------------------------------------------------------------
# Module
# ---------------------------------------------------------------------------
class GeneralizedRCNNTransform:
    def __init__(self, min_size, max_size, image_mean, image_std):
        if not isinstance(min_size, (list, tuple)):
            min_size = (min_size,)
        self.min_size = min_size
        self.max_size = max_size
        self.image_mean = jnp.asarray(image_mean, dtype=jnp.float32)
        self.image_std = jnp.asarray(image_std, dtype=jnp.float32)
        self.size_divisible = 32

    def forward(self, images, targets=None):
        assert all(img.ndim == 3 for img in images), "images must be [C, H, W]"
        size = float(self.min_size[-1])                         # eval-mode semantics
        max_size = float(self.max_size)

        orig_sizes = [(int(img.shape[-2]), int(img.shape[-1])) for img in images]
        new_sizes = [_resized_hw(h, w, size, max_size) for (h, w) in orig_sizes]

        # Common padded batch shape (max over resized sizes, rounded up to 32).
        pad_h = _round_up(max(nh for nh, _ in new_sizes), self.size_divisible)
        pad_w = _round_up(max(nw for _, nw in new_sizes), self.size_divisible)

        # Zero-pad raw inputs to a common bf16 slab (the cheap side; the big padded
        # output is written directly by the kernel). Hp/Wp aligned for bf16 tiles.
        Hmax = max(h for h, _ in orig_sizes)
        Wmax = max(w for _, w in orig_sizes)
        Hp = _round_up(Hmax, 16)
        Wp = _round_up(Wmax, 128)
        imgs = jnp.stack([
            jnp.pad(img.astype(jnp.bfloat16),
                    ((0, 0), (0, Hp - img.shape[-2]), (0, Wp - img.shape[-1])))
            for img in images])

        scale = (1.0 / self.image_std).astype(jnp.float32)              # 1/std
        bias = (-self.image_mean / self.image_std).astype(jnp.float32)  # -mean/std

        batched_imgs = _normalize_resize_batch(
            imgs, orig_sizes, new_sizes, pad_h, pad_w, scale, bias,
            out_dtype=jnp.float32)

        # Box rescale: trivial elementwise multiply, done in plain jnp by design.
        new_targets = None
        if targets is not None:
            new_targets = []
            for t, (h, w), (nh, nw) in zip(targets, orig_sizes, new_sizes):
                if t is None:
                    new_targets.append(None)
                    continue
                t = dict(t)
                ratio = jnp.asarray([nw / w, nh / h, nw / w, nh / h], dtype=jnp.float32)
                t["boxes"] = t["boxes"].astype(jnp.float32) * ratio[None, :]
                new_targets.append(t)

        image_sizes_list = [(int(nh), int(nw)) for (nh, nw) in new_sizes]
        # (ImageList equivalent: tensor + per-image resized sizes)
        return (batched_imgs, image_sizes_list), new_targets


# ---------------------------------------------------------------------------
# Main
# ---------------------------------------------------------------------------
if __name__ == "__main__":
    key = jax.random.PRNGKey(0)
    k0, k1, kb0, kb1 = jax.random.split(key, 4)

    # two small CHW images with different spatial sizes
    img0 = jax.random.uniform(k0, (3, 16, 16), dtype=jnp.float32)
    img1 = jax.random.uniform(k1, (3, 16, 24), dtype=jnp.float32)

    boxes0 = jnp.abs(jax.random.uniform(kb0, (4, 4), dtype=jnp.float32)) * 10.0
    boxes1 = jnp.abs(jax.random.uniform(kb1, (3, 4), dtype=jnp.float32)) * 10.0
    targets = [{"boxes": boxes0}, {"boxes": boxes1}]

    transform = GeneralizedRCNNTransform(
        min_size=20, max_size=40,
        image_mean=[0.485, 0.456, 0.406],
        image_std=[0.229, 0.224, 0.225])

    (batched, image_sizes), new_targets = transform.forward([img0, img1], targets)
    batched = jax.block_until_ready(batched)
    for t in new_targets:
        jax.block_until_ready(t["boxes"])

    # ---------------- reference checks ----------------
    images = [img0, img1]
    orig_sizes = [(16, 16), (16, 24)]
    new_sizes = [_resized_hw(h, w, 20.0, 40.0) for (h, w) in orig_sizes]
    pad_h, pad_w = batched.shape[-2:]
    Hmax = max(h for h, _ in orig_sizes)
    Wmax = max(w for _, w in orig_sizes)
    Hp = _round_up(Hmax, 16)
    Wp = _round_up(Wmax, 128)
    C = 3

    mean = transform.image_mean
    std = transform.image_std
    inv_std = 1.0 / std
    neg_ms = -mean / std
    scale = inv_std.astype(jnp.float32)
    bias = neg_ms.astype(jnp.float32)

    def ref_kernel_math(img, h, w, nh, nw, order, rows):
        """Mimics the kernel's bf16 matmul + epilogue path (tight check)."""
        img_p = jnp.pad(img, ((0, 0), (0, Hp - h), (0, Wp - w))).astype(jnp.bfloat16)
        wh = jnp.pad(_interp_matrix(h, nh, rows), ((0, 0), (0, Hp - h))).astype(jnp.bfloat16)
        wwT = jnp.pad(_interp_matrix(w, nw, pad_w).T, ((0, Wp - w), (0, 0))).astype(jnp.bfloat16)
        ridx = jnp.arange(pad_h)[:, None]
        cidx = jnp.arange(pad_w)[None, :]
        mask = ((ridx < nh) & (cidx < nw)).astype(jnp.float32)
        chans = []
        for c in range(img.shape[0]):
            if order == "wh_first":
                tmp = jnp.dot(wh, img_p[c], preferred_element_type=jnp.float32)
                mm = jnp.dot(tmp.astype(jnp.bfloat16), wwT, preferred_element_type=jnp.float32)
            else:
                tmp = jnp.dot(img_p[c], wwT, preferred_element_type=jnp.float32).astype(jnp.bfloat16)
                mm = jnp.dot(wh, tmp, preferred_element_type=jnp.float32)
            chans.append((mm[:pad_h] * inv_std[c] + neg_ms[c]) * mask)
        return jnp.stack(chans)

    def ref_exact(img, h, w, nh, nw):
        """Full-precision reference of the module's math (loose check)."""
        wh = _interp_matrix(h, nh, pad_h)
        wwT = _interp_matrix(w, nw, pad_w).T
        norm = (img - mean[:, None, None]) / std[:, None, None]
        return jnp.einsum("ph,chw,wq->cpq", wh, norm, wwT)

    order, _, _, rows, _ = _plan(C, Hp, Wp, pad_h, pad_w, 4)
    assert batched.shape == (2, 3, pad_h, pad_w)
    for i, (img, (h, w), (nh, nw)) in enumerate(zip(images, orig_sizes, image_sizes)):
        r_tight = ref_kernel_math(img, h, w, nh, nw, order, rows)
        r_loose = ref_exact(img, h, w, nh, nw)
        assert jnp.max(jnp.abs(batched[i] - r_tight)) < 2e-2
        assert jnp.max(jnp.abs(batched[i] - r_loose)) < 6e-2

    # Exercise the other contraction order too (both kernel paths must run clean).
    other = "wh_first" if order == "ww_first" else "ww_first"
    imgs_slab = jnp.stack([
        jnp.pad(img.astype(jnp.bfloat16),
                ((0, 0), (0, Hp - img.shape[-2]), (0, Wp - img.shape[-1])))
        for img in images])
    batched_other = _normalize_resize_batch(
        imgs_slab, orig_sizes, new_sizes, pad_h, pad_w, scale, bias, order=other)
    batched_other = jax.block_until_ready(batched_other)
    _, _, _, rows_other, _ = _plan(C, Hp, Wp, pad_h, pad_w, 4, order=other)
    for i, (img, (h, w), (nh, nw)) in enumerate(zip(images, orig_sizes, new_sizes)):
        r_tight = ref_kernel_math(img, h, w, nh, nw, other, rows_other)
        assert jnp.max(jnp.abs(batched_other[i] - r_tight)) < 2e-2

    for t, t_in, (h, w), (nh, nw) in zip(new_targets, targets, orig_sizes, image_sizes):
        expect = t_in["boxes"] * jnp.asarray([nw / w, nh / h, nw / w, nh / h], jnp.float32)
        assert jnp.max(jnp.abs(t["boxes"] - expect)) < 1e-5

    print("KERNEL_OK")
</pallas_src>

<mosaic_0001>
module attributes {stable_mosaic.version = 11 : i64} {
  func.func @_norm_resize_ww_first_kernel(%arg0: i32, %arg1: i32, %arg2: memref<3xf32, #tpu.memory_space<smem>>, %arg3: memref<3xf32, #tpu.memory_space<smem>>, %arg4: memref<2xi32, #tpu.memory_space<smem>>, %arg5: memref<2xi32, #tpu.memory_space<smem>>, %arg6: memref<1x3x16x128xbf16, #tpu.memory_space<vmem>>, %arg7: memref<1x32x16xbf16, #tpu.memory_space<vmem>>, %arg8: memref<1x128x32xbf16, #tpu.memory_space<vmem>>, %arg9: memref<1x3x32x32xf32, #tpu.memory_space<vmem>>, %arg10: memref<3x16x32xbf16, #tpu.memory_space<vmem>>) attributes {dimension_semantics = [#tpu.dimension_semantics<parallel>, #tpu.dimension_semantics<arbitrary>], iteration_bounds = array<i64: 2, 1>, scalar_prefetch = 4 : i64, scratch_operands = 1 : i64, tpu.core_type = #tpu.core_type<tc>, window_params = [{transform_indices = @transform_0, window_bounds = array<i64: 1, 3, 16, 128>}, {transform_indices = @transform_1, window_bounds = array<i64: 1, 32, 16>}, {transform_indices = @transform_2, window_bounds = array<i64: 1, 128, 32>}, {transform_indices = @transform_3, window_bounds = array<i64: 1, 3, 32, 32>}]} {
    %c0_i32 = arith.constant 0 : i32
    %0 = arith.cmpi eq, %arg1, %c0_i32 : i32
    %1 = arith.extui %0 : i1 to i32
    %c0_i32_0 = arith.constant 0 : i32
    %2 = arith.cmpi ne, %1, %c0_i32_0 : i32
    scf.if %2 {
      %c0_30 = arith.constant 0 : index
      %c0_31 = arith.constant 0 : index
      %c0_32 = arith.constant 0 : index
      %c0_33 = arith.constant 0 : index
      %60 = vector.load %arg6[%c0_30, %c0_31, %c0_32, %c0_33] : memref<1x3x16x128xbf16, #tpu.memory_space<vmem>>, vector<1x1x16x128xbf16>
      %61 = vector.shape_cast %60 : vector<1x1x16x128xbf16> to vector<16x128xbf16>
      %c0_34 = arith.constant 0 : index
      %c0_35 = arith.constant 0 : index
      %c0_36 = arith.constant 0 : index
      %62 = vector.load %arg8[%c0_34, %c0_35, %c0_36] : memref<1x128x32xbf16, #tpu.memory_space<vmem>>, vector<1x128x32xbf16>
      %63 = vector.shape_cast %62 : vector<1x128x32xbf16> to vector<128x32xbf16>
      %cst_37 = arith.constant dense<0.000000e+00> : vector<16x32xf32>
      %64 = tpu.matmul %61, %63, %cst_37 {dimension_numbers = #tpu.dot_dimension_numbers<[1], [0], [0], [1], [0, 0, 1, 1], [], []>} : vector<16x128xbf16>, vector<128x32xbf16>, vector<16x32xf32> -> vector<16x32xf32>
      %65 = arith.truncf %64 : vector<16x32xf32> to vector<16x32xbf16>
      %c0_38 = arith.constant 0 : index
      %c0_39 = arith.constant 0 : index
      %c0_40 = arith.constant 0 : index
      %66 = vector.load %arg10[%c0_38, %c0_39, %c0_40] : memref<3x16x32xbf16, #tpu.memory_space<vmem>>, vector<1x16x32xbf16>
      %67 = vector.shape_cast %66 : vector<1x16x32xbf16> to vector<16x32xbf16>
      %68 = vector.shape_cast %65 : vector<16x32xbf16> to vector<1x16x32xbf16>
      tpu.vector_store %arg10[%c0_38, %c0_39, %c0_40], %68 {strides = array<i32>} : memref<3x16x32xbf16, #tpu.memory_space<vmem>>, vector<1x16x32xbf16>,
      %c0_41 = arith.constant 0 : index
      %c1_42 = arith.constant 1 : index
      %c0_43 = arith.constant 0 : index
      %c0_44 = arith.constant 0 : index
      %69 = vector.load %arg6[%c0_41, %c1_42, %c0_43, %c0_44] : memref<1x3x16x128xbf16, #tpu.memory_space<vmem>>, vector<1x1x16x128xbf16>
      %70 = vector.shape_cast %69 : vector<1x1x16x128xbf16> to vector<16x128xbf16>
      %c0_45 = arith.constant 0 : index
      %c0_46 = arith.constant 0 : index
      %c0_47 = arith.constant 0 : index
      %71 = vector.load %arg8[%c0_45, %c0_46, %c0_47] : memref<1x128x32xbf16, #tpu.memory_space<vmem>>, vector<1x128x32xbf16>
      %72 = vector.shape_cast %71 : vector<1x128x32xbf16> to vector<128x32xbf16>
      %cst_48 = arith.constant dense<0.000000e+00> : vector<16x32xf32>
      %73 = tpu.matmul %70, %72, %cst_48 {dimension_numbers = #tpu.dot_dimension_numbers<[1], [0], [0], [1], [0, 0, 1, 1], [], []>} : vector<16x128xbf16>, vector<128x32xbf16>, vector<16x32xf32> -> vector<16x32xf32>
      %74 = arith.truncf %73 : vector<16x32xf32> to vector<16x32xbf16>
      %c1_49 = arith.constant 1 : index
      %c0_50 = arith.constant 0 : index
      %c0_51 = arith.constant 0 : index
      %75 = vector.load %arg10[%c1_49, %c0_50, %c0_51] : memref<3x16x32xbf16, #tpu.memory_space<vmem>>, vector<1x16x32xbf16>
      %76 = vector.shape_cast %75 : vector<1x16x32xbf16> to vector<16x32xbf16>
      %77 = vector.shape_cast %74 : vector<16x32xbf16> to vector<1x16x32xbf16>
      tpu.vector_store %arg10[%c1_49, %c0_50, %c0_51], %77 {strides = array<i32>} : memref<3x16x32xbf16, #tpu.memory_space<vmem>>, vector<1x16x32xbf16>,
      %c0_52 = arith.constant 0 : index
      %c2_53 = arith.constant 2 : index
      %c0_54 = arith.constant 0 : index
      %c0_55 = arith.constant 0 : index
      %78 = vector.load %arg6[%c0_52, %c2_53, %c0_54, %c0_55] : memref<1x3x16x128xbf16, #tpu.memory_space<vmem>>, vector<1x1x16x128xbf16>
      %79 = vector.shape_cast %78 : vector<1x1x16x128xbf16> to vector<16x128xbf16>
      %c0_56 = arith.constant 0 : index
      %c0_57 = arith.constant 0 : index
      %c0_58 = arith.constant 0 : index
      %80 = vector.load %arg8[%c0_56, %c0_57, %c0_58] : memref<1x128x32xbf16, #tpu.memory_space<vmem>>, vector<1x128x32xbf16>
      %81 = vector.shape_cast %80 : vector<1x128x32xbf16> to vector<128x32xbf16>
      %cst_59 = arith.constant dense<0.000000e+00> : vector<16x32xf32>
      %82 = tpu.matmul %79, %81, %cst_59 {dimension_numbers = #tpu.dot_dimension_numbers<[1], [0], [0], [1], [0, 0, 1, 1], [], []>} : vector<16x128xbf16>, vector<128x32xbf16>, vector<16x32xf32> -> vector<16x32xf32>
      %83 = arith.truncf %82 : vector<16x32xf32> to vector<16x32xbf16>
      %c2_60 = arith.constant 2 : index
      %c0_61 = arith.constant 0 : index
      %c0_62 = arith.constant 0 : index
      %84 = vector.load %arg10[%c2_60, %c0_61, %c0_62] : memref<3x16x32xbf16, #tpu.memory_space<vmem>>, vector<1x16x32xbf16>
      %85 = vector.shape_cast %84 : vector<1x16x32xbf16> to vector<16x32xbf16>
      %86 = vector.shape_cast %83 : vector<16x32xbf16> to vector<1x16x32xbf16>
      tpu.vector_store %arg10[%c2_60, %c0_61, %c0_62], %86 {strides = array<i32>} : memref<3x16x32xbf16, #tpu.memory_space<vmem>>, vector<1x16x32xbf16>,
    } else {
    }
    %c0 = arith.constant 0 : index
    %c0_1 = arith.constant 0 : index
    %c0_2 = arith.constant 0 : index
    %3 = vector.load %arg7[%c0, %c0_1, %c0_2] : memref<1x32x16xbf16, #tpu.memory_space<vmem>>, vector<1x32x16xbf16>
    %4 = vector.shape_cast %3 : vector<1x32x16xbf16> to vector<32x16xbf16>
    %5 = tpu.iota {dimensions = array<i32: 0>} : vector<32x32xi32>
    %c32_i32 = arith.constant 32 : i32
    %6 = arith.muli %arg1, %c32_i32 : i32
    %7 = vector.broadcast %6 : i32 to vector<32x32xi32>
    %8 = arith.addi %5, %7 : vector<32x32xi32>
    %9 = tpu.iota {dimensions = array<i32: 1>} : vector<32x32xi32>
    %10 = arith.index_cast %arg0 : i32 to index
    %11 = memref.load %arg4[%10] : memref<2xi32, #tpu.memory_space<smem>>
    %12 = vector.broadcast %11 : i32 to vector<32x32xi32>
    %13 = arith.cmpi slt, %8, %12 : vector<32x32xi32>
    %14 = arith.index_cast %arg0 : i32 to index
    %15 = memref.load %arg5[%14] : memref<2xi32, #tpu.memory_space<smem>>
    %16 = vector.broadcast %15 : i32 to vector<32x32xi32>
    %17 = arith.cmpi slt, %9, %16 : vector<32x32xi32>
    %18 = arith.andi %13, %17 : vector<32x32xi1>
    %19 = arith.extui %18 : vector<32x32xi1> to vector<32x32xi32>
    %20 = arith.sitofp %19 : vector<32x32xi32> to vector<32x32xf32>
    %c0_3 = arith.constant 0 : index
    %c0_4 = arith.constant 0 : index
    %c0_5 = arith.constant 0 : index
    %21 = vector.load %arg10[%c0_3, %c0_4, %c0_5] : memref<3x16x32xbf16, #tpu.memory_space<vmem>>, vector<1x16x32xbf16>
    %22 = vector.shape_cast %21 : vector<1x16x32xbf16> to vector<16x32xbf16>
    %cst = arith.constant dense<0.000000e+00> : vector<32x32xf32>
    %23 = tpu.matmul %4, %22, %cst {dimension_numbers = #tpu.dot_dimension_numbers<[1], [0], [0], [1], [0, 0, 1, 1], [], []>} : vector<32x16xbf16>, vector<16x32xbf16>, vector<32x32xf32> -> vector<32x32xf32>
    %c0_6 = arith.constant 0 : index
    %24 = memref.load %arg2[%c0_6] : memref<3xf32, #tpu.memory_space<smem>>
    %25 = vector.broadcast %24 : f32 to vector<32x32xf32>
    %26 = arith.mulf %23, %25 : vector<32x32xf32>
    %c0_7 = arith.constant 0 : index
    %27 = memref.load %arg3[%c0_7] : memref<3xf32, #tpu.memory_space<smem>>
    %28 = vector.broadcast %27 : f32 to vector<32x32xf32>
    %29 = arith.addf %26, %28 : vector<32x32xf32>
    %30 = arith.mulf %29, %20 : vector<32x32xf32>
    %c0_8 = arith.constant 0 : index
    %c0_9 = arith.constant 0 : index
    %c0_10 = arith.constant 0 : index
    %c0_11 = arith.constant 0 : index
    %31 = vector.load %arg9[%c0_8, %c0_9, %c0_10, %c0_11] : memref<1x3x32x32xf32, #tpu.memory_space<vmem>>, vector<1x1x32x32xf32>
    %32 = vector.shape_cast %31 : vector<1x1x32x32xf32> to vector<32x32xf32>
    %33 = vector.shape_cast %30 : vector<32x32xf32> to vector<1x1x32x32xf32>
    tpu.vector_store %arg9[%c0_8, %c0_9, %c0_10, %c0_11], %33 {strides = array<i32>} : memref<1x3x32x32xf32, #tpu.memory_space<vmem>>, vector<1x1x32x32xf32>,
    %c1 = arith.constant 1 : index
    %c0_12 = arith.constant 0 : index
    %c0_13 = arith.constant 0 : index
    %34 = vector.load %arg10[%c1, %c0_12, %c0_13] : memref<3x16x32xbf16, #tpu.memory_space<vmem>>, vector<1x16x32xbf16>
    %35 = vector.shape_cast %34 : vector<1x16x32xbf16> to vector<16x32xbf16>
    %cst_14 = arith.constant dense<0.000000e+00> : vector<32x32xf32>
    %36 = tpu.matmul %4, %35, %cst_14 {dimension_numbers = #tpu.dot_dimension_numbers<[1], [0], [0], [1], [0, 0, 1, 1], [], []>} : vector<32x16xbf16>, vector<16x32xbf16>, vector<32x32xf32> -> vector<32x32xf32>
    %c1_15 = arith.constant 1 : index
    %37 = memref.load %arg2[%c1_15] : memref<3xf32, #tpu.memory_space<smem>>
    %38 = vector.broadcast %37 : f32 to vector<32x32xf32>
    %39 = arith.mulf %36, %38 : vector<32x32xf32>
    %c1_16 = arith.constant 1 : index
    %40 = memref.load %arg3[%c1_16] : memref<3xf32, #tpu.memory_space<smem>>
    %41 = vector.broadcast %40 : f32 to vector<32x32xf32>
    %42 = arith.addf %39, %41 : vector<32x32xf32>
    %43 = arith.mulf %42, %20 : vector<32x32xf32>
    %c0_17 = arith.constant 0 : index
    %c1_18 = arith.constant 1 : index
    %c0_19 = arith.constant 0 : index
    %c0_20 = arith.constant 0 : index
    %44 = vector.load %arg9[%c0_17, %c1_18, %c0_19, %c0_20] : memref<1x3x32x32xf32, #tpu.memory_space<vmem>>, vector<1x1x32x32xf32>
    %45 = vector.shape_cast %44 : vector<1x1x32x32xf32> to vector<32x32xf32>
    %46 = vector.shape_cast %43 : vector<32x32xf32> to vector<1x1x32x32xf32>
    tpu.vector_store %arg9[%c0_17, %c1_18, %c0_19, %c0_20], %46 {strides = array<i32>} : memref<1x3x32x32xf32, #tpu.memory_space<vmem>>, vector<1x1x32x32xf32>,
    %c2 = arith.constant 2 : index
    %c0_21 = arith.constant 0 : index
    %c0_22 = arith.constant 0 : index
    %47 = vector.load %arg10[%c2, %c0_21, %c0_22] : memref<3x16x32xbf16, #tpu.memory_space<vmem>>, vector<1x16x32xbf16>
    %48 = vector.shape_cast %47 : vector<1x16x32xbf16> to vector<16x32xbf16>
    %cst_23 = arith.constant dense<0.000000e+00> : vector<32x32xf32>
    %49 = tpu.matmul %4, %48, %cst_23 {dimension_numbers = #tpu.dot_dimension_numbers<[1], [0], [0], [1], [0, 0, 1, 1], [], []>} : vector<32x16xbf16>, vector<16x32xbf16>, vector<32x32xf32> -> vector<32x32xf32>
    %c2_24 = arith.constant 2 : index
    %50 = memref.load %arg2[%c2_24] : memref<3xf32, #tpu.memory_space<smem>>
    %51 = vector.broadcast %50 : f32 to vector<32x32xf32>
    %52 = arith.mulf %49, %51 : vector<32x32xf32>
    %c2_25 = arith.constant 2 : index
    %53 = memref.load %arg3[%c2_25] : memref<3xf32, #tpu.memory_space<smem>>
    %54 = vector.broadcast %53 : f32 to vector<32x32xf32>
    %55 = arith.addf %52, %54 : vector<32x32xf32>
    %56 = arith.mulf %55, %20 : vector<32x32xf32>
    %c0_26 = arith.constant 0 : index
    %c2_27 = arith.constant 2 : index
    %c0_28 = arith.constant 0 : index
    %c0_29 = arith.constant 0 : index
    %57 = vector.load %arg9[%c0_26, %c2_27, %c0_28, %c0_29] : memref<1x3x32x32xf32, #tpu.memory_space<vmem>>, vector<1x1x32x32xf32>
    %58 = vector.shape_cast %57 : vector<1x1x32x32xf32> to vector<32x32xf32>
    %59 = vector.shape_cast %56 : vector<32x32xf32> to vector<1x1x32x32xf32>
    tpu.vector_store %arg9[%c0_26, %c2_27, %c0_28, %c0_29], %59 {strides = array<i32>} : memref<1x3x32x32xf32, #tpu.memory_space<vmem>>, vector<1x1x32x32xf32>,
    return
  }
  func.func @transform_0(%arg0: i32, %arg1: i32, %arg2: memref<3xf32, #tpu.memory_space<smem>>, %arg3: memref<3xf32, #tpu.memory_space<smem>>, %arg4: memref<2xi32, #tpu.memory_space<smem>>, %arg5: memref<2xi32, #tpu.memory_space<smem>>) -> (i32, i32, i32, i32) {
    %c0_i32 = arith.constant 0 : i32
    %c0_i32_0 = arith.constant 0 : i32
    %c0_i32_1 = arith.constant 0 : i32
    %c0_i32_2 = arith.constant 0 : i32
    return %arg0, %c0_i32, %c0_i32_0, %c0_i32_1 : i32, i32, i32, i32
  }
  func.func @transform_1(%arg0: i32, %arg1: i32, %arg2: memref<3xf32, #tpu.memory_space<smem>>, %arg3: memref<3xf32, #tpu.memory_space<smem>>, %arg4: memref<2xi32, #tpu.memory_space<smem>>, %arg5: memref<2xi32, #tpu.memory_space<smem>>) -> (i32, i32, i32) {
    %c0_i32 = arith.constant 0 : i32
    %c0_i32_0 = arith.constant 0 : i32
    return %arg0, %arg1, %c0_i32 : i32, i32, i32
  }
  func.func @transform_2(%arg0: i32, %arg1: i32, %arg2: memref<3xf32, #tpu.memory_space<smem>>, %arg3: memref<3xf32, #tpu.memory_space<smem>>, %arg4: memref<2xi32, #tpu.memory_space<smem>>, %arg5: memref<2xi32, #tpu.memory_space<smem>>) -> (i32, i32, i32) {
    %c0_i32 = arith.constant 0 : i32
    %c0_i32_0 = arith.constant 0 : i32
    %c0_i32_1 = arith.constant 0 : i32
    return %arg0, %c0_i32, %c0_i32_0 : i32, i32, i32
  }
  func.func @transform_3(%arg0: i32, %arg1: i32, %arg2: memref<3xf32, #tpu.memory_space<smem>>, %arg3: memref<3xf32, #tpu.memory_space<smem>>, %arg4: memref<2xi32, #tpu.memory_space<smem>>, %arg5: memref<2xi32, #tpu.memory_space<smem>>) -> (i32, i32, i32, i32) {
    %c0_i32 = arith.constant 0 : i32
    %c0_i32_0 = arith.constant 0 : i32
    %c0_i32_1 = arith.constant 0 : i32
    return %arg0, %c0_i32, %arg1, %c0_i32_0 : i32, i32, i32, i32
  }
}

</mosaic_0001>

<bundles_post_ra>
// kernel: tpu_custom_call.1
= control target key start
LH: loop header
LB: loop body
LE: loop exit
PB: predicated region body
PF: predicated region fallthrough
CT: control target
= control target key end

     0   :  { %s1784_s0 = inlined_call_operand.vmem [shape: f32[3], index: 0, kind: input, shape index: {}]   ;;  %s1785_s4 = inlined_call_operand.vmem [shape: bf16[2,3,16,128], index: 4, kind: input, shape index: {}]   ;;  %s1786_s5 = inlined_call_operand.vmem [shape: bf16[2,32,16], index: 5, kind: input, shape index: {}]   ;;  %s1787_s6 = inlined_call_operand.vmem [shape: bf16[2,128,32], index: 6, kind: input, shape index: {}]   ;;  %s1788_s7 = inlined_call_operand.hbm [shape: f32[2,3,32,32], index: 7, kind: output, shape index: {}]   ;;  %s1789_s1 = inlined_call_operand.vmem [shape: f32[3], index: 1, kind: input, shape index: {}]   ;;  %s1790_s2 = inlined_call_operand.vmem [shape: s32[2], index: 2, kind: input, shape index: {}]   ;;  %s1791_s3 = inlined_call_operand.vmem [shape: s32[2], index: 3, kind: input, shape index: {}]  }
   0x1   :  { %s12_s26 = sshll.u32 %s1784_s0, 4  ;;  %s16_s29 = sshll.u32 %s1789_s1, 4  ;;  %s13_s26 = int_to_ptr.vmem [resolvable:$true] %s12_s26  ;;  %s17_s29 = int_to_ptr.vmem [resolvable:$true] %s16_s29 }
   0x2   :  { %s1348_s30 = scalar_lea.vmem %s13_s26, 16  ;;  %p1353_p1 = scmp.lt.s32.totalorder %s13_s26, %s13_s26 }
   0x3   :  { %p1349_p0 = scmp.ne.s32.totalorder %s13_s26, %s1348_s30  ;;  %p1354_p2 = scmp.lt.s32.totalorder %s1348_s30, %s1348_s30 }
   0x5   :  { %p1355_p3 = por %p1354_p2, %p1353_p1 }
   0x7   :  { %p1356_p4 = pnand %p1355_p3, %p1349_p0 }
   0x9   :  { %1359 = shalt.err (!%p1356_p4)  }
   0xa   :  { %s1476_s8 = smov [#allocation4]   ;;  %s1360_s9 = scalar_lea.vmem %s17_s29, 16 }
   0xb   :  { %15 = dma.vmem_to_smem %s13_s26, 16, %s1476_s8, [#allocation3] }
   0xc   :  { %p1361_p5 = scmp.ne.s32.totalorder %s17_s29, %s1360_s9  ;;  %p1365_p6 = scmp.lt.s32.totalorder %s17_s29, %s17_s29 }
   0xd   :  { %p1366_p7 = scmp.lt.s32.totalorder %s1360_s9, %s1360_s9 }
   0xf   :  { %p1367_p8 = por %p1366_p7, %p1365_p6 }
  0x11   :  { %p1368_p9 = pnand %p1367_p8, %p1361_p5 }
  0x13   :  { %1371 = shalt.err (!%p1368_p9)  }
  0x14   :  { %s1477_s0 = smov [#allocation5]   ;;  %s20_s11 = sshll.u32 %s1790_s2, 4  ;;  %s21_s11 = int_to_ptr.vmem [resolvable:$true] %s20_s11 }
  0x15   :  { %19 = dma.vmem_to_smem %s17_s29, 16, %s1477_s0, [#allocation3] }
  0x16   :  { %s24_s14 = sshll.u32 %s1791_s3, 4  ;;  %s1372_s15 = scalar_lea.vmem %s21_s11, 16  ;;  %s25_s14 = int_to_ptr.vmem [resolvable:$true] %s24_s14 }
  0x17   :  { %p1373_p10 = scmp.ne.s32.totalorder %s21_s11, %s1372_s15  ;;  %p1377_p11 = scmp.lt.s32.totalorder %s21_s11, %s21_s11 }
  0x18   :  { %p1378_p12 = scmp.lt.s32.totalorder %s1372_s15, %s1372_s15 }
  0x1a   :  { %p1379_p13 = por %p1378_p12, %p1377_p11 }
  0x1c   :  { %p1380_p0 = pnand %p1379_p13, %p1373_p10 }
  0x1e   :  { %1383 = shalt.err (!%p1380_p0)  }
  0x1f   :  { %s1478_s16 = smov [#allocation6]   ;;  %s1384_s17 = scalar_lea.vmem %s25_s14, 16 }
  0x20   :  { %23 = dma.vmem_to_smem %s21_s11, 16, %s1478_s16, [#allocation3] }
  0x21   :  { %p1385_p1 = scmp.ne.s32.totalorder %s25_s14, %s1384_s17  ;;  %p1389_p2 = scmp.lt.s32.totalorder %s25_s14, %s25_s14 }
  0x22   :  { %p1390_p3 = scmp.lt.s32.totalorder %s1384_s17, %s1384_s17 }
  0x24   :  { %p1391_p4 = por %p1390_p3, %p1389_p2 }
  0x26   :  { %p1392_p5 = pnand %p1391_p4, %p1385_p1 }
  0x28   :  { %1395 = shalt.err (!%p1392_p5)  }
  0x29   :  { %s1479_s2 = smov [#allocation7]  }
  0x2a   :  { %27 = dma.vmem_to_smem %s25_s14, 16, %s1479_s2, [#allocation3] }
  0x2b   :  { %1446 = dma.done.wait [#allocation3], 64 }
  0x2c   :  { %1447 = vsyncadd [#allocation3], 4294967232 }
  0x2d   :  { %29 = sfence }
  0x2e   :  { %30 = vsyncpa [#allocation9], 0 }
  0x2f   :  { %32 = vsyncpa [#allocation9 + $0x1], 0  ;;  %s1537_s3 = smov 0   ;;  %s1539_s18 = smov 0  }
  0x30   :  { %s1541_s19 = smov 0   ;;  %s1543_s20 = smov 0  }
  0x31   :  { %s1545_s21 = smov 0   ;;  %s1547_s22 = smov 0  }
  0x32 LB: > { %s1051_s23 = sadd.s32 4294967295, %s1474_s22   ;;  %s1052_s24 = sadd.s32 4294967294, %s1474_s22   ;;  %s1474_s22 = sphi %s1547_s22, %s38_s22   ;;  %s1470_s21 = sphi %s1545_s21, %s1800_s21   ;;  %s1466_s20 = sphi %s1543_s20, %s1799_s20   ;;  %s1462_s19 = sphi %s1541_s19, %s1798_s19   ;;  %s1458_s18 = sphi %s1539_s18, %s1797_s18   ;;  %s1454_s3 = sphi %s1537_s3, %s1796_s3  }
  0x33   : > { %s50_s25 = sadd.s32 1, %s1470_s21  ;;  %s139_s26 = sadd.s32 1, %s1462_s19 }
  0x34   : > { %p52_p6 = scmp.ge.s32.totalorder %s50_s25, 2  ;;  %p149_p7 = scmp.ne.s32.totalorder %s1462_s19, %s1458_s18 }
  0x35   : > { %p150_p8 = scmp.eq.s32.totalorder %s1051_s23, 1  ;;  %p155_p9 = scmp.ne.s32.totalorder %s1458_s18, %s1454_s3 }
  0x36   : > { %s1802_s25 = smov (%p52_p6, %s50_s25), 0  ;;  %p156_p11 = scmp.eq.s32.totalorder %s1052_s24, 1 }
  0x37   : > { %p1577_p10 = por %p150_p8, %p149_p7  ;;  %s134_s28 = ssub.s32 %s1470_s21, %s1802_s25 }
  0x38   : > { %p1055_p12 = scmp.ge.s32.totalorder %s1474_s22, 1  ;;  %p137_p13 = scmp.eq.s32.totalorder %s134_s28, 0 }
  0x39   : > { %p1584_p0 = por %p156_p11, %p155_p9  ;;  %p203_p1 = scmp.lt.s32.totalorder %s1474_s22, 3 }
  0x3a   : > { %s1590_s30 = scalar_select %p137_p13, %s1462_s19, %s139_s26  }
  0x3b   : > { %p204_p2 = pnand %p1055_p12, %p203_p1 }
  0x3c   : > { %p241_p3 = scmp.lt.s32.totalorder (!%p204_p2), %s1466_s20, 1  ;;  %s658_s23 = sld [smem:[#allocation6 + %s1466_s20]] (!%p204_p2) }
  0x3d   : > { %207 = sbr.rel (%p204_p2) target bundleno = 564 (0x234), region = 32  ;;  %s664_s24 = sld [smem:[#allocation7 + %s1466_s20]] (!%p204_p2) }
  0x3e   : > { %s753_s26 = sld [smem:[#allocation4]] (!%p204_p2)  ;;  %s1252_s13 = smul.u32 (!%p204_p2), 1536, %s1466_s20 }
  0x3f   : > { %s759_s28 = sld [smem:[#allocation5]] (!%p204_p2) }
  0x40   : > { %s1111_s1 = sld [smem:[#allocation5 + $0x1]] (!%p204_p2)  ;;  %s1729_s17 = scalar_lea.hbm (!%p204_p2), %s1788_s7, %s1252_s13 }
  0x41   : > { %s1120_s12 = sld [smem:[#allocation5 + $0x2]] (!%p204_p2) }
  0x42   : > { %v1480_v0 = vmov 0.0   ;;  %s1596_s8 = scalar_select %p241_p3, %s1466_s20, 1  ;;  %vm1481_vm0 = vmmov 0   ;;  %vm697_vm1 = vcmask 130048   ;;  %vm388_vm2 = vcmask 257024  }
  0x43   : > { %1172 = vmatprep.subr.bf16.mxu0 %v1480_v0  ;;  %1192 = vmatprep.subr.bf16.mxu1 %v1480_v0  ;;  %v645_v51 = vlaneseq  ;;  %v659_v55 = vstv %s658_s23  ;;  %v665_v56 = vstv %s664_s24  ;;  %vm769_vm11 = vcmask 261120   ;;  %s1482_s23 = smov [#allocation8]  }
  0x44   : > { %1188 = vmatprep.mubr.msk.bf16.mxu0 %vm1481_vm0, %v1480_v0  ;;  %1208 = vmatprep.mubr.msk.bf16.mxu1 %vm1481_vm0, %v1480_v0  ;;  %s1129_s9 = sshll.u32 %s1596_s8, 6  ;;  %s1251_s11 = smul.u32 24, %s1596_s8  ;;  %v754_v59 = vstv %s753_s26 }
  0x45   : > { %s1606_s10 = scalar_lea.vmem %s1787_s6, %s1129_s9  ;;  %s1128_s15 = sshll.u32 %s1596_s8, 4  ;;  %v646_v52 = vshrl.u32 %v645_v51, 7  ;;  %v657_v54 = vand.u32 127, %v645_v51  ;;  %v760_v62 = vstv %s759_s28 }
  0x46   : > { %v1316_v1 = vld [vmem:[%s1606_s10 + $0x38] sm:$0xff]   ;;  %v1317_v2 = vld [vmem:[%s1606_s10 + $0x30] sm:$0xff]   ;;  %v1318_v4 = vld [vmem:[%s1606_s10 + $0x28] sm:$0xff]   ;;  %s1623_s14 = scalar_lea.vmem %s1785_s4, %s1251_s11  ;;  %s254_s2 = scalar_lea.vmem %s1786_s5, %s1128_s15 }
  0x47   : > { %1173 = vmatpush3.bf16.msra.mxu0 %v1316_v1  ;;  %v1321_v3 = vld [vmem:[%s1606_s10 + $0x38] sm:$0xff]   ;;  %v1323_v5 = vld [vmem:[%s1606_s10 + $0x30] sm:$0xff]   ;;  %v1319_v6 = vld [vmem:[%s1606_s10 + $0x20] sm:$0xff]   ;;  %v648_v53 = vadd.s32 16, %v646_v52  ;;  %vm1683_vm4 = vcmp.lt.s32.totalorder %v657_v54, %v665_v56  ;;  %v649_v58 = vadd.s32 24, %v646_v52  ;;  %s238_s8 = sand.u32 1, %s1458_s18   ;;  %vm660_vm5 = vcmp.lt.s32.totalorder %v646_v52, %v659_v55 }
  0x48   : > { %1174 = vmatprep.subr.bf16.mxu0 %v1480_v0  ;;  %1193 = vmatpush3.bf16.msra.mxu1 %v1321_v3  ;;  %v1325_v7 = vld [vmem:[%s1606_s10 + $0x28] sm:$0xff]   ;;  %v1320_v8 = vld [vmem:[%s1606_s10 + $0x18] sm:$0xff]   ;;  %v1327_v9 = vld [vmem:[%s1606_s10 + $0x20] sm:$0xff]   ;;  %v647_v60 = vadd.s32 8, %v646_v52  ;;  %s1110_s9 = sld [smem:[#allocation4 + $0x1]]  ;;  %s1250_s0 = smul.u32 96, %s238_s8 }
  0x49   : > { %1194 = vmatprep.subr.bf16.mxu1 %v1480_v0  ;;  %v1322_v10 = vld [vmem:[%s1606_s10 + $0x10] sm:$0xff]   ;;  %v1330_v11 = vld [vmem:[%s1606_s10 + $0x18] sm:$0xff]   ;;  %v1324_v12 = vld [vmem:[%s1606_s10 + $0x8] sm:$0xff]   ;;  %vm662_vm3 = vcmp.lt.s32.totalorder %v648_v53, %v659_v55  ;;  %vm663_vm7 = vcmp.lt.s32.totalorder %v649_v58, %v659_v55  ;;  %s1119_s11 = sld [smem:[#allocation4 + $0x2]]  ;;  %s1739_s20 = scalar_lea.sflag [#allocation9], %s238_s8 }
  0x4a   : > { %v1332_v13 = vld [vmem:[%s1606_s10 + $0x10] sm:$0xff]   ;;  %v1326_v14 = vld [vmem:[%s1606_s10] sm:$0xff]   ;;  %v1334_v15 = vld [vmem:[%s1606_s10 + $0x8] sm:$0xff]   ;;  %vm661_vm9 = vcmp.lt.s32.totalorder %v647_v60, %v659_v55  ;;  %s1400_s24 = sshll.u32 %s1482_s23, 4  ;;  %s1401_s24 = int_to_ptr.vmem [resolvable:$false] %s1400_s24 }
  0x4b   : > { %1175 = vmatpush3.bf16.msra.mxu0 %v1317_v2  ;;  %v1328_v16 = vld [vmem:[%s1623_s14] sm:$0xff]   ;;  %v1329_v17 = vld [vmem:[%s1606_s10 + $0x38] sm:$0xff]   ;;  %v1331_v19 = vld [vmem:[%s1606_s10 + $0x30] sm:$0xff]   ;;  %s1402_s26 = scalar_lea.vmem %s1401_s24, 3072 }
  0x4c   : > { %1176 = vmatprep.subr.bf16.mxu0 %v1480_v0  ;;  %1195 = vmatpush3.bf16.msra.mxu1 %v1323_v5  ;;  %v1336_v18 = vld [vmem:[%s1606_s10] sm:$0xff]   ;;  %v1338_v20 = vld [vmem:[%s1623_s14 + $0x8] sm:$0xff]   ;;  %v1337_v23 = vld [vmem:[%s1606_s10 + $0x18] sm:$0xff]  }
  0x4d   : > { %1196 = vmatprep.subr.bf16.mxu1 %v1480_v0  ;;  %v1333_v21 = vld [vmem:[%s1606_s10 + $0x28] sm:$0xff]   ;;  %v1335_v22 = vld [vmem:[%s1606_s10 + $0x20] sm:$0xff]   ;;  %v1339_v24 = vld [vmem:[%s1606_s10 + $0x10] sm:$0xff]  }
  0x4e   : > { %v1340_v25 = vld [vmem:[%s1606_s10 + $0x8] sm:$0xff]   ;;  %v1341_v26 = vld [vmem:[%s1606_s10] sm:$0xff]   ;;  %v1342_v27 = vld [vmem:[%s1623_s14 + $0x10] sm:$0xff]   ;;  %s1701_s10 = scalar_lea.vmem [#allocation8], %s1250_s0 }
  0x4f   : > { %1177 = vmatpush3.bf16.msra.mxu0 %v1318_v4  ;;  %v1344_v28 = vld [vmem:[%s254_s2] sm:$0xff]   ;;  %v1345_v42 = vld [vmem:[%s254_s2 + $0x8] sm:$0xff]   ;;  %vm669_vm6 = vmand %vm662_vm3, %vm1683_vm4  ;;  %s948_s14 = sshll.u32 %s1701_s10, 4  ;;  %s1731_s14 = int_to_ptr.vmem [resolvable:$true] %s948_s14 }
  0x50   : > { %1178 = vmatprep.subr.bf16.mxu0 %v1480_v0  ;;  %1197 = vmatpush3.bf16.msra.mxu1 %v1325_v7  ;;  %vm667_vm8 = vmand %vm660_vm5, %vm1683_vm4  ;;  %v1100_v1 = vsel %vm669_vm6, 1.0, %v1480_v0  ;;  %s1396_s2 = scalar_lea.vmem %s1731_s14, 1536  ;;  %p1403_p7 = scmp.lt.s32.totalorder %s1731_s14, %s1401_s24 }
  0x51   : > { %1198 = vmatprep.subr.bf16.mxu1 %v1480_v0  ;;  %vm670_vm10 = vmand %vm663_vm7, %vm1683_vm4  ;;  %v1098_v5 = vsel %vm667_vm8, 1.0, %v1480_v0  ;;  %p1397_p4 = scmp.ne.s32.totalorder %s1731_s14, %s1396_s2  ;;  %p1404_p8 = scmp.lt.s32.totalorder %s1402_s26, %s1396_s2 }
  0x52   : > { %vm668_vm12 = vmand %vm661_vm9, %vm1683_vm4 }
  0x53   : > { %1179 = vmatpush3.bf16.msra.mxu0 %v1319_v6  ;;  %p1398_p5 = pnand %p1397_p4, %p1577_p10  ;;  %p1405_p9 = por %p1404_p8, %p1403_p7 }
  0x54   : > { %1180 = vmatprep.subr.bf16.mxu0 %v1480_v0  ;;  %1199 = vmatpush3.bf16.msra.mxu1 %v1327_v9 }
  0x55   : > { %1200 = vmatprep.subr.bf16.mxu1 %v1480_v0  ;;  %p1399_p6 = pneg %p1398_p5 }
  0x57   : > { %1181 = vmatpush3.bf16.msra.mxu0 %v1320_v8  ;;  %p1406_p11 = pnand %p1405_p9, %p1399_p6 }
  0x58   : > { %1182 = vmatprep.subr.bf16.mxu0 %v1480_v0  ;;  %1201 = vmatpush3.bf16.msra.mxu1 %v1330_v11 }
  0x59   : > { %1202 = vmatprep.subr.bf16.mxu1 %v1480_v0 }
  0x5b   : > { %1183 = vmatpush3.bf16.msra.mxu0 %v1322_v10  ;;  %v1101_v10 = vsel %vm670_vm10, 1.0, %v1480_v0 }
  0x5c   : > { %1184 = vmatprep.subr.bf16.mxu0 %v1480_v0  ;;  %1203 = vmatpush3.bf16.msra.mxu1 %v1332_v13 }
  0x5d   : > { %1204 = vmatprep.subr.bf16.mxu1 %v1480_v0 }
  0x5f   : > { %1185 = vmatpush3.bf16.msra.mxu0 %v1324_v12  ;;  %v833_v12 = vstv %s1110_s9 }
  0x60   : > { %1186 = vmatprep.subr.bf16.mxu0 %v1480_v0  ;;  %1205 = vmatpush3.bf16.msra.mxu1 %v1334_v15 }
  0x61   : > { %1206 = vmatprep.subr.bf16.mxu1 %v1480_v0 }
  0x63   : > { %1187 = vmatpush3.bf16.msra.mxu0 %v1326_v14 }
  0x64   : > { %1212 = vmatprep.subr.bf16.mxu0 %v1480_v0  ;;  %1207 = vmatpush3.bf16.msra.mxu1 %v1336_v18  ;;  %v839_v18 = vstv %s1111_s1 }
  0x66   : > { %1189 = vmatmul.mubr.bf16.vlgmr.msra.gmra.mxu0 %v1328_v16  ;;  %v1099_v16 = vsel %vm668_vm12, 1.0, %v1480_v0 }
  0x67   : > { %1213 = vmatpush3.bf16.msra.mxu0 %v1329_v17  ;;  %1228 = vmatprep.mubr.msk.bf16.mxu0 %vm1481_vm0, %v1480_v0 }
  0x68   : > { %1214 = vmatprep.subr.bf16.mxu0 %v1480_v0  ;;  %1209 = vmatmul.mubr.bf16.vlgmr.msra.gmra.mxu1 %v1338_v20 }
  0x69   : > { %1234 = vmatprep.mubr.msk.bf16.mxu1 %vm697_vm1, %v1344_v28 }
  0x6b   : > { %1215 = vmatpush3.bf16.msra.mxu0 %v1331_v19 }
  0x6c   : > { %1216 = vmatprep.subr.bf16.mxu0 %v1480_v0 }
  0x6f   : > { %1217 = vmatpush3.bf16.msra.mxu0 %v1333_v21 }
  0x70   : > { %1218 = vmatprep.subr.bf16.mxu0 %v1480_v0 }
  0x73   : > { %1219 = vmatpush3.bf16.msra.mxu0 %v1335_v22 }
  0x74   : > { %1220 = vmatprep.subr.bf16.mxu0 %v1480_v0 }
  0x77   : > { %1221 = vmatpush3.bf16.msra.mxu0 %v1337_v23 }
  0x78   : > { %1222 = vmatprep.subr.bf16.mxu0 %v1480_v0 }
  0x7b   : > { %1223 = vmatpush3.bf16.msra.mxu0 %v1339_v24 }
  0x7c   : > { %1224 = vmatprep.subr.bf16.mxu0 %v1480_v0 }
  0x7f   : > { %1225 = vmatpush3.bf16.msra.mxu0 %v1340_v25 }
  0x80   : > { %1226 = vmatprep.subr.bf16.mxu0 %v1480_v0 }
  0x83   : > { %1227 = vmatpush3.bf16.msra.mxu0 %v1341_v26 }
  0x86   : > { %1229 = vmatmul.mubr.bf16.vlgmr.msra.gmra.mxu0 %v1342_v27 }
 0x126   : > { %v373_v29 = vpop.f32.mrf.mxu0 }
 0x127   : > { %v1130_v30 = vpack.c.bf16 %v373_v29, %v373_v29 }
 0x128   : > { %v1190_v31 = vpop.f32.mrf.mxu0  ;;  %v498_v34 = vpop.f32.mrf.mxu1 }
 0x129   : > { %389 = vst.msk [vmem:[#allocation2] sm:$0xf] %vm388_vm2, %v1130_v30  ;;  %v1132_v36 = vpack.c.bf16 %v498_v34, %v498_v34 }
 0x12a   : > { %v376_v32 = vpop.f32.mrf.mxu0  ;;  %v1210_v37 = vpop.f32.mrf.mxu1 }
 0x12b   : > { %v1131_v33 = vpack.c.bf16 %v376_v32, %v376_v32  ;;  %514 = vst.msk [vmem:[#allocation2 + $0x8] sm:$0xf] %vm388_vm2, %v1132_v36  ;;  %v912_v36 = vstv %s1119_s11 }
 0x12c   : > { %v1191_v35 = vpop.f32.mrf.mxu0  ;;  %v501_v38 = vpop.f32.mrf.mxu1 }
 0x12d   : > { %390 = vst.msk [vmem:[#allocation2 + $0x4] sm:$0xf] %vm388_vm2, %v1131_v33  ;;  %v1133_v39 = vpack.c.bf16 %v501_v38, %v501_v38  ;;  %v918_v38 = vstv %s1120_s12 }
 0x12e   : > { %v1211_v40 = vpop.f32.mrf.mxu1 }
 0x12f   : > { %515 = vst.msk [vmem:[#allocation2 + $0xc] sm:$0xf] %vm388_vm2, %v1133_v39 }
 0x134   : > { %v1343_v41 = vld [vmem:[#allocation2] sm:$0xff]  }
 0x135   : > { %1232 = vmatprep.subr.bf16.mxu1 %v1343_v41 }
 0x136   : > { %1233 = vmatpush3.bf16.msra.mxu1 %v1343_v41  ;;  %v1346_v43 = vld [vmem:[#allocation2 + $0x8] sm:$0xff]  }
 0x137   : > { %1238 = vmatprep.subr.bf16.mxu1 %v1346_v43 }
 0x139   : > { %1235 = vmatmul.mubr.msk.bf16.vlgmr.msra.gmra.mxu1 %vm697_vm1, %v1345_v42 }
 0x13a   : > { %1240 = vmatprep.mubr.msk.bf16.mxu1 %vm697_vm1, %v1344_v28  ;;  %1239 = vmatpush3.bf16.msra.mxu1 %v1346_v43 }
 0x141   : > { %1241 = vmatmul.mubr.msk.bf16.vlgmr.msra.gmra.mxu1 %vm697_vm1, %v1345_v42 }
 0x142   : > { %1246 = vmatprep.mubr.msk.bf16.mxu1 %vm697_vm1, %v1344_v28 }
 0x146   : > { %v623_v44 = vpop.f32.mrf.mxu0 }
 0x147   : > { %v1134_v45 = vpack.c.bf16 %v623_v44, %v623_v44 }
 0x148   : > { %v1230_v46 = vpop.f32.mrf.mxu0 }
 0x149   : > { %639 = vst.msk [vmem:[#allocation2 + $0x10] sm:$0xf] %vm388_vm2, %v1134_v45 }
 0x14a   : > { %v626_v47 = vpop.f32.mrf.mxu0 }
 0x14b   : > { %v1135_v48 = vpack.c.bf16 %v626_v47, %v626_v47 }
 0x14c   : > { %v1231_v49 = vpop.f32.mrf.mxu0 }
 0x14d   : > { %640 = vst.msk [vmem:[#allocation2 + $0x14] sm:$0xf] %vm388_vm2, %v1135_v48 }
 0x154   : > { %v1347_v50 = vld [vmem:[#allocation2 + $0x10] sm:$0xff]  }
 0x155   : > { %1244 = vmatprep.subr.bf16.mxu1 %v1347_v50 }
 0x156   : > { %1245 = vmatpush3.bf16.msra.mxu1 %v1347_v50 }
 0x159   : > { %1247 = vmatmul.mubr.msk.bf16.vlgmr.msra.gmra.mxu1 %vm697_vm1, %v1345_v42 }
 0x1f9   : > { %v1236_v61 = vpop.f32.mrf.mxu1 }
 0x1fa   : > { %v757_v63 = vmul.f32 %v1236_v61, %v754_v59 }
 0x1fb   : > { %v738_v2 = vpop.f32.mrf.mxu1 }
 0x1fc   : > { %v763_v3 = vadd.f32 %v760_v62, %v757_v63  ;;  %v755_v4 = vmul.f32 %v754_v59, %v738_v2 }
 0x1fd   : > { %v1237_v6 = vpop.f32.mrf.mxu1 }
 0x1fe   : > { %v767_v7 = vmul.f32 %v1100_v1, %v763_v3  ;;  %v761_v8 = vadd.f32 %v760_v62, %v755_v4  ;;  %v758_v9 = vmul.f32 %v1237_v6, %v754_v59 }
 0x1ff   : > { %v741_v11 = vpop.f32.mrf.mxu1 }
 0x200   : > { %772 = vst.msk [vmem:[%s1701_s10 + $0x10] sm:$0xff] %vm769_vm11, %v767_v7  ;;  %v765_v13 = vmul.f32 %v1098_v5, %v761_v8  ;;  %v764_v14 = vadd.f32 %v760_v62, %v758_v9  ;;  %v756_v15 = vmul.f32 %v754_v59, %v741_v11 }
 0x201   : > { %v1242_v17 = vpop.f32.mrf.mxu1 }
 0x202   : > { %770 = vst.msk [vmem:[%s1701_s10] sm:$0xff] %vm769_vm11, %v765_v13  ;;  %v768_v19 = vmul.f32 %v1101_v10, %v764_v14  ;;  %v762_v20 = vadd.f32 %v760_v62, %v756_v15  ;;  %v836_v21 = vmul.f32 %v1242_v17, %v833_v12 }
 0x203   : > { %v817_v22 = vpop.f32.mrf.mxu1 }
 0x204   : > { %773 = vst.msk [vmem:[%s1701_s10 + $0x18] sm:$0xff] %vm769_vm11, %v768_v19  ;;  %v766_v23 = vmul.f32 %v1099_v16, %v762_v20  ;;  %v842_v24 = vadd.f32 %v839_v18, %v836_v21  ;;  %v834_v25 = vmul.f32 %v833_v12, %v817_v22 }
 0x205   : > { %v1243_v26 = vpop.f32.mrf.mxu1 }
 0x206   : > { %771 = vst.msk [vmem:[%s1701_s10 + $0x8] sm:$0xff] %vm769_vm11, %v766_v23  ;;  %v846_v0 = vmul.f32 %v1100_v1, %v842_v24  ;;  %v840_v27 = vadd.f32 %v839_v18, %v834_v25  ;;  %v837_v28 = vmul.f32 %v1243_v26, %v833_v12 }
 0x207   : > { %v820_v29 = vpop.f32.mrf.mxu1 }
 0x208   : > { %1114 = vst.msk [vmem:[%s1701_s10 + $0x30] sm:$0xff] %vm769_vm11, %v846_v0  ;;  %v844_v30 = vmul.f32 %v1098_v5, %v840_v27  ;;  %v843_v31 = vadd.f32 %v839_v18, %v837_v28  ;;  %v835_v32 = vmul.f32 %v833_v12, %v820_v29 }
 0x20a   : > { %1112 = vst.msk [vmem:[%s1701_s10 + $0x20] sm:$0xff] %vm769_vm11, %v844_v30  ;;  %v847_v33 = vmul.f32 %v1101_v10, %v843_v31  ;;  %v841_v34 = vadd.f32 %v839_v18, %v835_v32 }
 0x20c   : > { %1115 = vst.msk [vmem:[%s1701_s10 + $0x38] sm:$0xff] %vm769_vm11, %v847_v33  ;;  %v845_v35 = vmul.f32 %v1099_v16, %v841_v34 }
 0x20e   : > { %1113 = vst.msk [vmem:[%s1701_s10 + $0x28] sm:$0xff] %vm769_vm11, %v845_v35 }
 0x219   : > { %v1248_v37 = vpop.f32.mrf.mxu1 }
 0x21a   : > { %v915_v39 = vmul.f32 %v1248_v37, %v912_v36 }
 0x21b   : > { %v896_v40 = vpop.f32.mrf.mxu1 }
 0x21c   : > { %v921_v41 = vadd.f32 %v918_v38, %v915_v39  ;;  %v913_v42 = vmul.f32 %v912_v36, %v896_v40 }
 0x21d   : > { %v1249_v43 = vpop.f32.mrf.mxu1 }
 0x21e   : > { %v925_v44 = vmul.f32 %v1100_v1, %v921_v41  ;;  %v919_v45 = vadd.f32 %v918_v38, %v913_v42  ;;  %v916_v46 = vmul.f32 %v1249_v43, %v912_v36 }
 0x21f   : > { %v899_v47 = vpop.f32.mrf.mxu1 }
 0x220   : > { %1123 = vst.msk [vmem:[%s1701_s10 + $0x50] sm:$0xff] %vm769_vm11, %v925_v44  ;;  %v923_v48 = vmul.f32 %v1098_v5, %v919_v45  ;;  %v922_v49 = vadd.f32 %v918_v38, %v916_v46  ;;  %v914_v50 = vmul.f32 %v912_v36, %v899_v47 }
 0x222   : > { %1121 = vst.msk [vmem:[%s1701_s10 + $0x40] sm:$0xff] %vm769_vm11, %v923_v48  ;;  %v926_v51 = vmul.f32 %v1101_v10, %v922_v49  ;;  %v920_v52 = vadd.f32 %v918_v38, %v914_v50 }
 0x224   : > { %1124 = vst.msk [vmem:[%s1701_s10 + $0x58] sm:$0xff] %vm769_vm11, %v926_v51  ;;  %v924_v53 = vmul.f32 %v1099_v16, %v920_v52 }
 0x226   : > { %1122 = vst.msk [vmem:[%s1701_s10 + $0x48] sm:$0xff] %vm769_vm11, %v924_v53 }
 0x227   : > { %1409 = shalt.err (!%p1406_p11)
}
 0x228   : > { %s1410_s28 = scalar_lea.hbm %s1729_s17, 1536  ;;  %s1414_s0 = scalar_lea.hbm %s1788_s7, 3072 }
 0x229   : > { %p1411_p12 = scmp.ne.s32.totalorder %s1729_s17, %s1410_s28  ;;  %p1415_p2 = scmp.lt.s32.totalorder %s1729_s17, %s1788_s7 }
 0x22a   : > { %p1416_p3 = scmp.lt.s32.totalorder %s1414_s0, %s1410_s28 }
 0x22b   : > { %p1412_p13 = pnand %p1411_p12, %p1577_p10 }
 0x22c   : > { %p1417_p4 = por %p1416_p3, %p1415_p2 }
 0x22d   : > { %p1413_p1 = pneg %p1412_p13 }
 0x22f   : > { %p1418_p5 = pnand %p1417_p4, %p1413_p1 }
 0x231   : > { %1421 = shalt.err (!%p1418_p5)
}
 0x232   : > { %s1483_s11 = smov 128   ;;  %s1484_s12 = smov 8  }
 0x233   : > { %1253 = dma.vmem_to_hbm [thread:$0]  (%p1577_p10), %s1731_s14, 1536, %s1729_s17, %s1739_s20, %s1483_s11, %s1483_s11, %s1484_s12  }
 0x234 PF: > { %p1259_p6 = scmp.ge.s32.totalorder %s1474_s22, 2  ;;  %s963_s13 = sand.u32 1, %s1454_s3  }
 0x235   : > { %s964_s15 = scalar_lea.sflag [#allocation9], %s963_s13 }
 0x236   : > { %p1256_p7 = pnand %p1259_p6, %p1584_p0 }
 0x238   : > { %p1257_p8 = pneg %p1256_p7 }
 0x23a   : > { %1449 = dma.done.wait (%p1257_p8), %s964_s15, 1536  }
 0x23b   : > { %1451 = vsyncadd (%p1257_p8), %s964_s15, 4294965760  ;;  %s38_s22 = sadd.s32 1, %s1474_s22   ;;  %s1796_s3 = smov %s1458_s18 }
 0x23c   : > { %p35_p9 = scmp.ge.s32.totalorder %s38_s22, 4   ;;  %s1797_s18 = smov %s1462_s19 }
 0x23d   : > { %s1798_s19 = smov %s1590_s30  ;;  %s1799_s20 = smov %s1470_s21 }
 0x23e   : > { %s1800_s21 = smov %s1802_s25  ;;  %37 = sbr.rel (!%p35_p9) target bundleno = 50 (0x32), region = 85 }
 0x243   :  { %969 = vsyncpa [#allocation9], 1 }
 0x244   :  { %971 = vsyncpa [#allocation9 + $0x1], 1 }

</bundles_post_ra>
